<compile_context>
chip_gen: v6e
topology: v6e:2x2x1
jax: 0.10.0
libtpu: 0.0.40
codegen_flags: <defaults>
</compile_context>

<pallas_src>
import functools
import math

import jax
import jax.numpy as jnp
from jax import lax
from jax.experimental import pallas as pl
from jax.experimental.pallas import tpu as pltpu

_INV_SQRT2 = 1.0 / math.sqrt(2.0)


def _round_up(a, m):
    return (a + m - 1) // m * m


def _std_normal_cdf(d):
    # Normal(0, 1).cdf(d) == 0.5 * (1 + erf(d / sqrt(2)))  (exact, matches torch)
    return 0.5 * (1.0 + lax.erf(d * _INV_SQRT2))


def _bs_math(log_price, ttm, *, sigma, r, log_strike):
    """Black-Scholes call price; formula identical to the PyTorch reference."""
    price = jnp.exp(log_price)
    sqrt_ttm = jnp.sqrt(ttm)
    # True divide (not an rsqrt rewrite) so ttm == 0 gives d1 = +/-inf like the reference.
    d1 = (log_price - log_strike + (r + 0.5 * sigma * sigma) * ttm) / (sigma * sqrt_ttm)
    d2 = d1 - sigma * sqrt_ttm
    # strike * exp(-r*ttm) == exp(log_strike - r*ttm): one EUP exp, one VALU mul saved.
    discounted_strike = jnp.exp(log_strike - r * ttm)
    return price * _std_normal_cdf(d1) - discounted_strike * _std_normal_cdf(d2)


def _bs_kernel_interleaved(x_ref, out_ref, *, cols, sigma, r, log_strike):
    # x_ref holds the raw interleaved features: even lanes = log_price, odd lanes = ttm.
    log_price = x_ref[:, pl.ds(0, cols, stride=2)].astype(jnp.float32)
    ttm = x_ref[:, pl.ds(1, cols, stride=2)].astype(jnp.float32)
    out = _bs_math(log_price, ttm, sigma=sigma, r=r, log_strike=log_strike)
    out_ref[...] = out.astype(out_ref.dtype)


def _bs_kernel_planes(logp_ref, ttm_ref, out_ref, *, sigma, r, log_strike):
    out = _bs_math(logp_ref[...].astype(jnp.float32), ttm_ref[...].astype(jnp.float32),
                   sigma=sigma, r=r, log_strike=log_strike)
    out_ref[...] = out.astype(out_ref.dtype)


@functools.lru_cache(maxsize=None)
def _lane_strided_loads_ok(dtype_name):
    """One-time probe: do lane-dim stride-2 ref loads lower (and compute correctly)?"""
    dtype = jnp.dtype(dtype_name)

    def probe(x_ref, even_ref, odd_ref):
        even_ref[...] = x_ref[:, pl.ds(0, 128, stride=2)]
        odd_ref[...] = x_ref[:, pl.ds(1, 128, stride=2)]

    try:
        x = jnp.arange(8 * 256, dtype=jnp.float32).astype(dtype).reshape(8, 256)
        even, odd = pl.pallas_call(
            probe,
            out_shape=(jax.ShapeDtypeStruct((8, 128), dtype),
                       jax.ShapeDtypeStruct((8, 128), dtype)),
        )(x)
        jax.block_until_ready((even, odd))
        return bool(jnp.array_equal(even, x[:, 0::2])) and bool(jnp.array_equal(odd, x[:, 1::2]))
    except Exception:
        # Lane-strided loads not supported on this toolchain/chip -> two-plane fallback.
        return False


def _choose_cols(n, max_cols=512):
    """Lane-dense per-plane width (multiple of 128), preferring >= 8 rows (sublane-full
    vregs) and pad-free shapes when possible."""
    for c in (512, 256, 128):
        if c <= max_cols and n >= 8 * c and n % c == 0:
            return c
    for c in (512, 256, 128):
        if c <= max_cols and n >= 8 * c:
            return c
    return 128


def black_scholes_price(x, *, sigma, risk_free_rate, strike, block_rows=512):
    """Pallas TPU implementation of BlackScholesPrice.forward.

    x: (..., 2) array with x[..., 0] = log_price, x[..., 1] = time_to_maturity.
    Returns (..., 1) in x.dtype (compute in f32 inside the kernel).
    """
    assert x.shape[-1] == 2, "expected trailing feature axis (log_price, ttm)"
    assert float(strike) > 0.0, "strike must be positive (reference takes strike.log())"

    lead_shape = x.shape[:-1]
    n = int(math.prod(lead_shape)) if lead_shape else 1
    out_dtype = x.dtype
    sigma = float(sigma)
    r = float(risk_free_rate)
    log_strike = math.log(float(strike))

    cols = _choose_cols(n)
    rows = pl.cdiv(n, cols)
    pad_pairs = rows * cols - n

    # Row-block size: multiple of 8 (sublane-full), <= block_rows (tile <= 2 MiB/input so
    # double-buffering fits v7x's 64 MiB VMEM), and >= 2 blocks whenever rows > 8 so the
    # "parallel" grid axis can be split across v7x's two TensorCores.
    if rows <= 8:
        br = rows
    else:
        br = min(block_rows, _round_up(pl.cdiv(rows, 2), 8))
    grid = (pl.cdiv(rows, br),)   # last block may be partial; Pallas masks the store

    flat = x.reshape(-1)          # interleaved [lp0, ttm0, lp1, ttm1, ...], zero-copy
    if pad_pairs:
        # Single pad of the interleaved array (was: two concatenates on split planes).
        flat = jnp.pad(flat, (0, 2 * pad_pairs), constant_values=1.0)

    out_spec = pl.BlockSpec((br, cols), lambda i: (i, 0))
    # Per-step VMEM footprint: double-buffered input + output tiles, plus headroom for
    # f32 intermediates / internal scratch. Bounded well below v7x's 64 MiB.
    tile_bytes = br * cols * (2 * jnp.dtype(x.dtype).itemsize + jnp.dtype(out_dtype).itemsize)
    vmem_limit = int(min(64 * 1024 * 1024, 4 * tile_bytes + (8 << 20)))

    if _lane_strided_loads_ok(jnp.dtype(x.dtype).name):
        # Preferred path: one contiguous input DMA (8 B/pair), de-interleave in-kernel.
        operands = (flat.reshape(rows, 2 * cols),)
        in_specs = [pl.BlockSpec((br, 2 * cols), lambda i: (i, 0))]
        kernel = functools.partial(_bs_kernel_interleaved, cols=cols,
                                   sigma=sigma, r=r, log_strike=log_strike)
        fusion = [True]
    else:
        # Fallback (previous layout): stride-2 feature split in the wrapper; hint XLA to
        # fuse the slices into the kernel's input DMA where it can.
        logp = flat[0::2].reshape(rows, cols)
        ttm = flat[1::2].reshape(rows, cols)
        operands = (logp, ttm)
        spec = pl.BlockSpec((br, cols), lambda i: (i, 0))
        in_specs = [spec, spec]
        kernel = functools.partial(_bs_kernel_planes,
                                   sigma=sigma, r=r, log_strike=log_strike)
        fusion = [True, True]

    out = pl.pallas_call(
        kernel,
        out_shape=jax.ShapeDtypeStruct((rows, cols), out_dtype),
        grid_spec=pltpu.PrefetchScalarGridSpec(
            num_scalar_prefetch=0,
            grid=grid,
            in_specs=in_specs,
            out_specs=out_spec,
        ),
        compiler_params=pltpu.CompilerParams(
            dimension_semantics=("parallel",),
            allow_input_fusion=fusion,
            vmem_limit_bytes=vmem_limit,
        ),
    )(*operands)

    out = out.reshape(-1)
    if pad_pairs:
        out = out[:n]
    return out.reshape(*lead_shape, 1)


def _reference(x, sigma, r, strike):
    log_price = x[..., 0].astype(jnp.float32)
    ttm = x[..., 1].astype(jnp.float32)
    price = jnp.exp(log_price)
    sqrt_ttm = jnp.sqrt(ttm)
    d1 = (log_price - math.log(strike) + (r + sigma ** 2 / 2) * ttm) / (sigma * sqrt_ttm)
    d2 = d1 - sigma * sqrt_ttm
    out = price * _std_normal_cdf(d1) - strike * _std_normal_cdf(d2) * jnp.exp(-r * ttm)
    return out[..., None].astype(x.dtype)


if __name__ == "__main__":
    # Deterministic module parameters (BlackScholesPrice.__init__ args).
    sigma = 0.2
    risk_free_rate = 0.01
    strike = 1.0

    key = jax.random.PRNGKey(0)

    def make_case(k, shape):
        k1, k2 = jax.random.split(k)
        log_price = 0.1 * jax.random.normal(k1, shape, dtype=jnp.float32)
        ttm = jax.random.uniform(k2, shape, dtype=jnp.float32, minval=0.1, maxval=1.0)
        return jnp.stack([log_price, ttm], axis=-1)   # (..., 2)

    cases = [
        (8, 128),    # n = 1024  -> sublane-full tile, single block
        (64, 256),   # n = 16384 -> multi-block grid ("parallel" / megacore path)
        (5, 77),     # n = 385   -> ragged size (padding + small-rows layout path)
    ]
    keys = jax.random.split(key, len(cases))
    for k, shape in zip(keys, cases):
        x = make_case(k, shape)
        out = jax.block_until_ready(
            black_scholes_price(x, sigma=sigma, risk_free_rate=risk_free_rate, strike=strike))
        ref = _reference(x, sigma, risk_free_rate, strike)
        assert out.shape == (*shape, 1), (out.shape, shape)
        assert jnp.allclose(out, ref, atol=1e-5, rtol=1e-5), f"mismatch vs reference for {shape}"

    print("KERNEL_OK")
</pallas_src>

<mosaic_0001>
module attributes {stable_mosaic.version = 11 : i64} {
  func.func @probe(%arg0: memref<8x256xf32, #tpu.memory_space<vmem>>, %arg1: memref<8x128xf32, #tpu.memory_space<vmem>>, %arg2: memref<8x128xf32, #tpu.memory_space<vmem>>) attributes {dimension_semantics = [], scalar_prefetch = 0 : i64, scratch_operands = 0 : i64, tpu.core_type = #tpu.core_type<tc>} {
    %c0 = arith.constant 0 : index
    %c0_0 = arith.constant 0 : index
    %0 = tpu.strided_load %arg0[%c0, %c0_0] {strides = array<i32: 1, 2>} : memref<8x256xf32, #tpu.memory_space<vmem>>, vector<8x128xf32>
    %c0_1 = arith.constant 0 : index
    %c0_2 = arith.constant 0 : index
    %1 = vector.load %arg1[%c0_1, %c0_2] : memref<8x128xf32, #tpu.memory_space<vmem>>, vector<8x128xf32>
    tpu.vector_store %arg1[%c0_1, %c0_2], %0 {strides = array<i32>} : memref<8x128xf32, #tpu.memory_space<vmem>>, vector<8x128xf32>,
    %c0_3 = arith.constant 0 : index
    %c1 = arith.constant 1 : index
    %2 = tpu.strided_load %arg0[%c0_3, %c1] {strides = array<i32: 1, 2>} : memref<8x256xf32, #tpu.memory_space<vmem>>, vector<8x128xf32>
    %c0_4 = arith.constant 0 : index
    %c0_5 = arith.constant 0 : index
    %3 = vector.load %arg2[%c0_4, %c0_5] : memref<8x128xf32, #tpu.memory_space<vmem>>, vector<8x128xf32>
    tpu.vector_store %arg2[%c0_4, %c0_5], %2 {strides = array<i32>} : memref<8x128xf32, #tpu.memory_space<vmem>>, vector<8x128xf32>,
    return
  }
}

module attributes {stable_mosaic.version = 11 : i64} {
  func.func @_bs_kernel_planes(%arg0: i32, %arg1: memref<8x128xf32, #tpu.memory_space<vmem>>, %arg2: memref<8x128xf32, #tpu.memory_space<vmem>>, %arg3: memref<8x128xf32, #tpu.memory_space<vmem>>) attributes {dimension_semantics = [#tpu.dimension_semantics<parallel>], iteration_bounds = array<i64: 1>, scalar_prefetch = 0 : i64, scratch_operands = 0 : i64, tpu.core_type = #tpu.core_type<tc>, window_params = [{transform_indices = @transform_0, window_bounds = array<i64: 8, 128>}, {transform_indices = @transform_1, window_bounds = array<i64: 8, 128>}, {transform_indices = @transform_2, window_bounds = array<i64: 8, 128>}]} {
    %c0 = arith.constant 0 : index
    %c0_0 = arith.constant 0 : index
    %0 = vector.load %arg1[%c0, %c0_0] : memref<8x128xf32, #tpu.memory_space<vmem>>, vector<8x128xf32>
    %c0_1 = arith.constant 0 : index
    %c0_2 = arith.constant 0 : index
    %1 = vector.load %arg2[%c0_1, %c0_2] : memref<8x128xf32, #tpu.memory_space<vmem>>, vector<8x128xf32>
    %2 = math.exp %0 : vector<8x128xf32>
    %3 = math.sqrt %1 : vector<8x128xf32>
    %cst = arith.constant 0.000000e+00 : f32
    %4 = vector.broadcast %cst : f32 to vector<8x128xf32>
    %5 = arith.subf %0, %4 : vector<8x128xf32>
    %cst_3 = arith.constant 3.000000e-02 : f32
    %6 = vector.broadcast %cst_3 : f32 to vector<8x128xf32>
    %7 = arith.mulf %6, %1 : vector<8x128xf32>
    %8 = arith.addf %5, %7 : vector<8x128xf32>
    %cst_4 = arith.constant 2.000000e-01 : f32
    %9 = vector.broadcast %cst_4 : f32 to vector<8x128xf32>
    %10 = arith.mulf %9, %3 : vector<8x128xf32>
    %11 = arith.divf %8, %10 : vector<8x128xf32>
    %cst_5 = arith.constant 2.000000e-01 : f32
    %12 = vector.broadcast %cst_5 : f32 to vector<8x128xf32>
    %13 = arith.mulf %12, %3 : vector<8x128xf32>
    %14 = arith.subf %11, %13 : vector<8x128xf32>
    %cst_6 = arith.constant 0.00999999977 : f32
    %15 = vector.broadcast %cst_6 : f32 to vector<8x128xf32>
    %16 = arith.mulf %15, %1 : vector<8x128xf32>
    %cst_7 = arith.constant 0.000000e+00 : f32
    %17 = vector.broadcast %cst_7 : f32 to vector<8x128xf32>
    %18 = arith.subf %17, %16 : vector<8x128xf32>
    %19 = math.exp %18 : vector<8x128xf32>
    %cst_8 = arith.constant 0.707106769 : f32
    %20 = vector.broadcast %cst_8 : f32 to vector<8x128xf32>
    %21 = arith.mulf %11, %20 : vector<8x128xf32>
    %22 = math.erf %21 : vector<8x128xf32>
    %cst_9 = arith.constant 1.000000e+00 : f32
    %23 = vector.broadcast %cst_9 : f32 to vector<8x128xf32>
    %24 = arith.addf %23, %22 : vector<8x128xf32>
    %cst_10 = arith.constant 5.000000e-01 : f32
    %25 = vector.broadcast %cst_10 : f32 to vector<8x128xf32>
    %26 = arith.mulf %25, %24 : vector<8x128xf32>
    %27 = arith.mulf %2, %26 : vector<8x128xf32>
    %cst_11 = arith.constant 0.707106769 : f32
    %28 = vector.broadcast %cst_11 : f32 to vector<8x128xf32>
    %29 = arith.mulf %14, %28 : vector<8x128xf32>
    %30 = math.erf %29 : vector<8x128xf32>
    %cst_12 = arith.constant 1.000000e+00 : f32
    %31 = vector.broadcast %cst_12 : f32 to vector<8x128xf32>
    %32 = arith.addf %31, %30 : vector<8x128xf32>
    %cst_13 = arith.constant 5.000000e-01 : f32
    %33 = vector.broadcast %cst_13 : f32 to vector<8x128xf32>
    %34 = arith.mulf %33, %32 : vector<8x128xf32>
    %35 = arith.mulf %19, %34 : vector<8x128xf32>
    %36 = arith.subf %27, %35 : vector<8x128xf32>
    %c0_14 = arith.constant 0 : index
    %c0_15 = arith.constant 0 : index
    %37 = vector.load %arg3[%c0_14, %c0_15] : memref<8x128xf32, #tpu.memory_space<vmem>>, vector<8x128xf32>
    tpu.vector_store %arg3[%c0_14, %c0_15], %36 {strides = array<i32>} : memref<8x128xf32, #tpu.memory_space<vmem>>, vector<8x128xf32>,
    return
  }
  func.func @transform_0(%arg0: i32) -> (i32, i32) {
    %c0_i32 = arith.constant 0 : i32
    %c0_i32_0 = arith.constant 0 : i32
    return %arg0, %c0_i32 : i32, i32
  }
  func.func @transform_1(%arg0: i32) -> (i32, i32) {
    %c0_i32 = arith.constant 0 : i32
    %c0_i32_0 = arith.constant 0 : i32
    return %arg0, %c0_i32 : i32, i32
  }
  func.func @transform_2(%arg0: i32) -> (i32, i32) {
    %c0_i32 = arith.constant 0 : i32
    %c0_i32_0 = arith.constant 0 : i32
    return %arg0, %c0_i32 : i32, i32
  }
}

</mosaic_0001>

<bundles_post_ra>
// kernel: tpu_custom_call.1
= control target key start
LH: loop header
LB: loop body
LE: loop exit
PB: predicated region body
PF: predicated region fallthrough
CT: control target
= control target key end

     0   :  { %7 = vsyncpa [#allocation3], 0  ;;  %s193_s0 = inlined_call_operand.hbm [shape: f32[8,128], index: 0, kind: input, shape index: {}]   ;;  %s194_s1 = inlined_call_operand.hbm [shape: f32[8,128], index: 1, kind: input, shape index: {}]   ;;  %s195_s2 = inlined_call_operand.hbm [shape: f32[8,128], index: 2, kind: output, shape index: {}]  }
   0x1   :  { %8 = vsyncpa [#allocation6], 0 }
   0x2   :  { %9 = vsyncpa [#allocation4], 0  ;;  %s166_s9 = smov [#allocation2]   ;;  %s167_s11 = smov [#allocation5]  }
   0x3   :  { %s16_s10 = sshll.u32 %s166_s9, 4  ;;  %s26_s12 = sshll.u32 %s167_s11, 4  ;;  %s17_s10 = int_to_ptr.vmem [resolvable:$true] %s16_s10  ;;  %s27_s12 = int_to_ptr.vmem [resolvable:$true] %s26_s12 }
   0x4   :  { %s108_s13 = scalar_lea.vmem %s17_s10, 128  ;;  %p113_p1 = scmp.lt.s32.totalorder %s17_s10, %s17_s10 }
   0x5   :  { %p109_p0 = scmp.ne.s32.totalorder %s17_s10, %s108_s13  ;;  %p114_p2 = scmp.lt.s32.totalorder %s108_s13, %s108_s13 }
   0x7   :  { %p115_p3 = por %p114_p2, %p113_p1 }
   0x9   :  { %p116_p4 = pnand %p115_p3, %p109_p0 }
   0xb   :  { %119 = shalt.err (!%p116_p4)
}
   0xc   :  { %19 = dma.hbm_to_vmem [thread:$0]  %s193_s0, 128, %s17_s10, [#allocation3]  }
   0xd   :  { %s128_s16 = scalar_lea.vmem %s27_s12, 128  ;;  %p133_p6 = scmp.lt.s32.totalorder %s27_s12, %s27_s12 }
   0xe   :  { %p129_p5 = scmp.ne.s32.totalorder %s27_s12, %s128_s16  ;;  %p134_p7 = scmp.lt.s32.totalorder %s128_s16, %s128_s16 }
  0x10   :  { %p135_p8 = por %p134_p7, %p133_p6 }
  0x12   :  { %p136_p9 = pnand %p135_p8, %p129_p5 }
  0x14   :  { %139 = shalt.err (!%p136_p9)
}
  0x15   :  { %29 = dma.hbm_to_vmem [thread:$0]  %s194_s1, 128, %s27_s12, [#allocation6]  }
  0x16   :  { %160 = dma.done.wait [#allocation3], 128  }
  0x17   :  { %161 = vsyncadd [#allocation3], 4294967168 }
  0x18   :  { %162 = dma.done.wait [#allocation6], 128  }
  0x19   :  { %163 = vsyncadd [#allocation6], 4294967168  ;;  %v37_v0 = vld [vmem:[#allocation5] sm:$0xff]  ;;  %v36_v8 = vld [vmem:[#allocation2] sm:$0xff]  ;;  %s168_s0 = smov [#allocation7]  }
  0x1a   :  { %88 = vrsqrt.f32 %v37_v0  ;;  %vm42_vm0 = vcmp.eq.f32.partialorder %v37_v0, inf  ;;  %v45_v2 = vand.u32 2147483648, %v37_v0  ;;  %vm44_vm1 = vcmp.eq.f32.partialorder %v37_v0, 0.0  ;;  %s75_s1 = sshll.u32 %s168_s0, 4  ;;  %s76_s1 = int_to_ptr.vmem [resolvable:$true] %s75_s1 }
  0x1b   :  { %v47_v7 = vmul.f32 0.03, %v37_v0  ;;  %v53_v10 = vmul.f32 0.01, %v37_v0  ;;  %v38_v14 = vmul.f32 1.442695, %v36_v8  ;;  %p145_p11 = scmp.lt.s32.totalorder %s76_s1, %s76_s1 }
  0x1c   :  { %s140_s19 = scalar_lea.vmem %s76_s1, 128 }
  0x1d   :  { %v48_v9 = vadd.f32 %v47_v7, %v36_v8  ;;  %v54_v13 = vsub.f32 0.0, %v53_v10  ;;  %p141_p10 = scmp.ne.s32.totalorder %s76_s1, %s140_s19  ;;  %p146_p12 = scmp.lt.s32.totalorder %s140_s19, %s140_s19 }
  0x1f   :  { %v55_v17 = vmul.f32 1.442695, %v54_v13  ;;  %p147_p13 = por %p146_p12, %p145_p11 }
  0x21   :  { %p148_p0 = pnand %p147_p13, %p141_p10 }
  0x27   :  { %v89_v1 = vpop.eup %88 }
  0x28   :  { %v41_v3 = vmul.f32 %v89_v1, %v37_v0 }
  0x2a   :  { %v43_v4 = vsel %vm42_vm0, %v37_v0, %v41_v3 }
  0x2b   :  { %v46_v5 = vsel %vm44_vm1, %v45_v2, %v43_v4 }
  0x2c   :  { %v49_v6 = vmul.f32 0.2, %v46_v5 }
  0x2e   :  { %90 = vrcp.f32 %v49_v6 }
  0x3b   :  { %v91_v11 = vpop.eup %90 }
  0x3c   :  { %v51_v12 = vmul.f32 %v91_v11, %v48_v9 }
  0x3e   :  { %v52_v15 = vsub.f32 %v51_v12, %v49_v6  ;;  %v57_v16 = vmul.f32 0.70710677, %v51_v12 }
  0x40   :  { %92 = verf.f32 %v57_v16  ;;  %v62_v18 = vmul.f32 0.70710677, %v52_v15 }
  0x41   :  { %94 = vpow2.f32 %v38_v14 }
  0x42   :  { %96 = verf.f32 %v62_v18 }
  0x43   :  { %98 = vpow2.f32 %v55_v17 }
  0x4d   :  { %v93_v19 = vpop.eup %92 }
  0x4e   :  { %v95_v20 = vpop.eup %94  ;;  %v59_v21 = vadd.f32 1.0, %v93_v19 }
  0x4f   :  { %v97_v22 = vpop.eup %96 }
  0x50   :  { %v60_v23 = vmul.f32 0.5, %v59_v21  ;;  %v64_v24 = vadd.f32 1.0, %v97_v22  ;;  %v99_v25 = vpop.eup %98 }
  0x52   :  { %v61_v26 = vmul.f32 %v95_v20, %v60_v23  ;;  %v65_v27 = vmul.f32 0.5, %v64_v24 }
  0x54   :  { %v66_v28 = vmul.f32 %v99_v25, %v65_v27 }
  0x56   :  { %v67_v29 = vsub.f32 %v61_v26, %v66_v28 }
  0x58   :  { %68 = vst [vmem:[#allocation7] sm:$0xff] %v67_v29 }
  0x59   :  { %151 = shalt.err (!%p148_p0)
}
  0x5a   :  { %78 = dma.vmem_to_hbm [thread:$0]  %s76_s1, 128, %s195_s2, [#allocation4]  }
  0x5b   :  { %164 = dma.done.wait [#allocation4], 128  }
  0x5c   :  { %165 = vsyncadd [#allocation4], 4294967168 }
  0x5d   :  { %82 = vsyncpa [#allocation3], 1 }
  0x5e   :  { %83 = vsyncpa [#allocation6], 1 }
  0x5f   :  { %84 = vsyncpa [#allocation4], 1 }

</bundles_post_ra>
